<compile_context>
chip_gen: v5e
topology: v5e:2x2
jax: 0.10.0
libtpu: 0.0.40
codegen_flags: <defaults>
</compile_context>

<pallas_src>
import numpy as np
import jax
import jax.numpy as jnp
from jax.experimental import pallas as pl
from jax.experimental.pallas import tpu as pltpu


def position_encoding_init(n_position, emb_dim):
    """Init the sinusoid position encoding table (matches the PyTorch code)."""
    position_enc = np.array(
        [
            [pos / np.power(10000, 2 * (j // 2) / emb_dim) for j in range(emb_dim)]
            if pos != 0
            else np.zeros(emb_dim)
            for pos in range(n_position)
        ]
    )
    position_enc[1:, 0::2] = np.sin(position_enc[1:, 0::2])
    position_enc[1:, 1::2] = np.cos(position_enc[1:, 1::2])
    return jnp.asarray(position_enc, dtype=jnp.float32)


def _broadcast_row_kernel(row_ref, out_ref):
    # row_ref: (1, flat_tile)       f32 -- chunk of the flattened encoding slab
    # out_ref: (batch_tile, flat_tile) f32
    # Pure sublane-broadcast + lane-dense store; the kernel is HBM-store-bound.
    out_ref[...] = jnp.broadcast_to(row_ref[...], out_ref.shape)


_TINY_BYPASS_BYTES = 256 * 1024  # below this, plain XLA broadcast is strictly faster


def _vmem_budget_bytes():
    """Generation-aware budget for the kernel's resident VMEM buffers."""
    try:
        cap = int(pltpu.get_tpu_info().vmem_capacity_bytes)
    except Exception:  # no TPU info available at trace time -> be conservative
        cap = 64 << 20  # v7x-sized fallback
    # Never plan for more than 3/4 of physical VMEM, and cap at 48 MiB so tiles
    # sized on v5e/v6e (128 MiB) still double-buffer on v7x (64 MiB / TC).
    return min(48 << 20, (cap * 3) // 4)


def _choose_tiles(batch_size, flat, vmem_budget):
    elt = 4  # float32
    target_out_block = 8 << 20  # ~8 MiB output blocks: past the HBM-roofline knee

    # Flat-axis tile: multiple of 128 (lane-dense, unmasked vst).  Only tile the
    # flat axis when a single 8-row block would already exceed the target;
    # otherwise use the full width (block dim == array dim is always legal).
    flat_tile = flat
    if flat % 128 == 0 and 8 * flat * elt > target_out_block:
        flat_tile = max(128, ((target_out_block // (8 * elt)) // 128) * 128)
        flat_tile = min(flat_tile, flat)

    # Batch-axis tile: multiple of 8 (or the whole batch), sized to the target.
    rows = max(8, ((target_out_block // (flat_tile * elt)) // 8) * 8)
    batch_tile = batch_size if rows >= batch_size else rows

    # Keep 2x(output block) + 2x(input chunk) under the VMEM budget.
    def footprint(bt, ft):
        return 2 * bt * ft * elt + 2 * ft * elt

    while batch_tile > 8 and footprint(batch_tile, flat_tile) > vmem_budget:
        batch_tile = max(8, ((batch_tile // 2) // 8) * 8)

    # Guarantee >= 2 grid steps for non-trivial outputs so v7x's two TensorCores
    # both get work under dimension_semantics=("parallel", "parallel").
    out_bytes = batch_size * flat * elt
    single_step = pl.cdiv(batch_size, batch_tile) * pl.cdiv(flat, flat_tile) == 1
    if single_step and out_bytes > (4 << 20):
        if batch_size >= 16:
            batch_tile = max(8, (((batch_size + 1) // 2 + 7) // 8) * 8)
        elif flat_tile % 256 == 0:
            flat_tile //= 2

    return batch_tile, flat_tile, footprint(batch_tile, flat_tile)


def positional_encoder_forward(table, batch_size, max_len, *, force_kernel=False):
    """table: (max_len+1, emb_dim) f32 embedding weights. Returns (B, L, D) f32."""
    n_position, emb_dim = table.shape
    assert n_position == max_len + 1
    flat = max_len * emb_dim

    # Positions are arange(max_len): the encoding is a static contiguous slice
    # of the table, flattened so the kernel's trailing dim is lane-dense.
    row = table[:max_len, :].reshape(1, flat)

    out_bytes = batch_size * flat * 4
    if not force_kernel and out_bytes < _TINY_BYPASS_BYTES:
        # Launch + pipeline setup would dwarf the copy; let XLA broadcast.
        return jnp.broadcast_to(row, (batch_size, flat)).reshape(
            batch_size, max_len, emb_dim
        )

    vmem_budget = _vmem_budget_bytes()
    batch_tile, flat_tile, fp = _choose_tiles(batch_size, flat, vmem_budget)
    vmem_limit = int(min(vmem_budget, max(32 << 20, fp + (4 << 20))))

    grid = (pl.cdiv(batch_size, batch_tile), pl.cdiv(flat, flat_tile))

    out_flat = pl.pallas_call(
        _broadcast_row_kernel,
        out_shape=jax.ShapeDtypeStruct((batch_size, flat), jnp.float32),
        grid_spec=pltpu.PrefetchScalarGridSpec(
            num_scalar_prefetch=0,
            grid=grid,
            in_specs=[
                # One small flat-tile chunk of the row; same chunk for every
                # batch-tile step, new chunk only when the flat index changes.
                pl.BlockSpec((1, flat_tile), lambda b, f: (0, f)),
            ],
            out_specs=pl.BlockSpec((batch_tile, flat_tile), lambda b, f: (b, f)),
        ),
        compiler_params=pltpu.CompilerParams(
            dimension_semantics=("parallel", "parallel"),
            vmem_limit_bytes=vmem_limit,
        ),
        cost_estimate=pl.CostEstimate(
            flops=0, transcendentals=0, bytes_accessed=out_bytes + flat * 4
        ),
    )(row)

    return out_flat.reshape(batch_size, max_len, emb_dim)


class PositionalEncoderPallas:
    """JAX/Pallas equivalent of the PyTorch PositionalEncoder module."""

    def __init__(self, emb_dim, max_len, batch_size):
        self.emb_dim = emb_dim
        self.max_len = max_len
        self.batch_size = batch_size
        n_position = max_len + 1
        # Deterministic parameter init (same as the module's __init__).
        self.position_enc_weight = position_encoding_init(n_position, emb_dim)

    def get_absolute_pos(self):
        # Kept only for the reference check; the kernel path no longer needs it
        # because positions are always arange(max_len).
        pos = jnp.arange(self.max_len, dtype=jnp.int32)
        return jnp.broadcast_to(pos[None, :], (self.batch_size, self.max_len))

    def forward(self, *, force_kernel=False):
        return positional_encoder_forward(
            self.position_enc_weight, self.batch_size, self.max_len,
            force_kernel=force_kernel,
        )


if __name__ == "__main__":
    _ = jax.random.PRNGKey(0)  # inputs are deterministic positions; key unused

    # --- primary test: small shapes consistent with the module ---
    emb_dim, max_len, batch_size = 32, 8, 2
    model = PositionalEncoderPallas(emb_dim, max_len, batch_size)
    out = model.forward(force_kernel=True)  # force kernel path despite tiny size
    out = jax.block_until_ready(out)

    ref = model.position_enc_weight[model.get_absolute_pos()]
    assert out.shape == (batch_size, max_len, emb_dim)
    assert out.dtype == jnp.float32
    np.testing.assert_allclose(np.asarray(out), np.asarray(ref), rtol=1e-6, atol=1e-6)

    # --- secondary test: a slightly larger shape (multi-row broadcast) ---
    emb_dim2, max_len2, batch_size2 = 128, 64, 16
    model2 = PositionalEncoderPallas(emb_dim2, max_len2, batch_size2)
    out2 = jax.block_until_ready(model2.forward(force_kernel=True))
    ref2 = model2.position_enc_weight[model2.get_absolute_pos()]
    np.testing.assert_allclose(np.asarray(out2), np.asarray(ref2), rtol=1e-6, atol=1e-6)

    print("KERNEL_OK")
</pallas_src>

<mosaic_0001>
module attributes {stable_mosaic.version = 11 : i64} {
  func.func @_broadcast_row_kernel(%arg0: i32, %arg1: i32, %arg2: memref<1x256xf32, #tpu.memory_space<vmem>>, %arg3: memref<2x256xf32, #tpu.memory_space<vmem>>) attributes {dimension_semantics = [#tpu.dimension_semantics<parallel>, #tpu.dimension_semantics<parallel>], iteration_bounds = array<i64: 1, 1>, scalar_prefetch = 0 : i64, scratch_operands = 0 : i64, tpu.core_type = #tpu.core_type<tc>, window_params = [{transform_indices = @transform_0, window_bounds = array<i64: 1, 256>}, {transform_indices = @transform_1, window_bounds = array<i64: 2, 256>}]} {
    %c0 = arith.constant 0 : index
    %c0_0 = arith.constant 0 : index
    %0 = vector.load %arg2[%c0, %c0_0] : memref<1x256xf32, #tpu.memory_space<vmem>>, vector<1x256xf32>
    %1 = vector.shape_cast %0 : vector<1x256xf32> to vector<1x256xf32>
    %2 = vector.broadcast %1 : vector<1x256xf32> to vector<2x256xf32>
    %c0_1 = arith.constant 0 : index
    %c0_2 = arith.constant 0 : index
    %3 = vector.load %arg3[%c0_1, %c0_2] : memref<2x256xf32, #tpu.memory_space<vmem>>, vector<2x256xf32>
    tpu.vector_store %arg3[%c0_1, %c0_2], %2 {strides = array<i32>} : memref<2x256xf32, #tpu.memory_space<vmem>>, vector<2x256xf32>,
    return
  }
  func.func @transform_0(%arg0: i32, %arg1: i32) -> (i32, i32) {
    %c0_i32 = arith.constant 0 : i32
    %c0_i32_0 = arith.constant 0 : i32
    return %c0_i32, %arg1 : i32, i32
  }
  func.func @transform_1(%arg0: i32, %arg1: i32) -> (i32, i32) {
    %c0_i32 = arith.constant 0 : i32
    return %arg0, %arg1 : i32, i32
  }
}

</mosaic_0001>

<bundles_post_ra>
// kernel: tpu_custom_call.1
= control target key start
LH: loop header
LB: loop body
LE: loop exit
PB: predicated region body
PF: predicated region fallthrough
CT: control target
= control target key end

     0   :  { %6 = vsyncpa [#allocation3], 0  ;;  %s121_s0 = inlined_call_operand.hbm [shape: f32[1,256], index: 0, kind: input, shape index: {}]   ;;  %s122_s1 = inlined_call_operand.hbm [shape: f32[2,256], index: 1, kind: output, shape index: {}]  }
   0x1   :  { %7 = vsyncpa [#allocation4], 0  ;;  %s13_s8 = sshll.u32 %s121_s0, 4  ;;  %s103_s9 = smov [#allocation2]   ;;  %s14_s8 = int_to_ptr.hbm [resolvable:$true] %s13_s8 }
   0x2   :  { %s15_s10 = sshll.u32 %s103_s9, 4  ;;  %s16_s10 = int_to_ptr.vmem [resolvable:$true] %s15_s10 }
   0x3   :  { %18 = dma.hbm_to_vmem [thread:$0]  %s14_s8, 32, %s16_s10, [#allocation3]  }
   0x4   :  { %99 = dma.done.wait [#allocation3], 32  }
   0x5   :  { %100 = vsyncadd [#allocation3], 4294967264  ;;  %v23_v0 = vld [vmem:[#allocation2] sm:$0x3]  ;;  %s104_s11 = smov [#allocation5]   ;;  %s39_s15 = sshll.u32 %s122_s1, 4  ;;  %s40_s15 = int_to_ptr.hbm [resolvable:$true] %s39_s15 }
   0x6   :  { %v25_v1 = vperm.slane %v23_v0, 0  ;;  %v26_v2 = vperm.slane %v23_v0, 1  ;;  %s37_s12 = sshll.u32 %s104_s11, 4  ;;  %vm28_vm0 = vcmask 1041408   ;;  %s38_s12 = int_to_ptr.vmem [resolvable:$true] %s37_s12 }
   0x8   :  { %v27_v3 = vrot.slane %v26_v2, 6 }
   0xa   :  { %v29_v4 = vsel %vm28_vm0, %v25_v1, %v27_v3 }
   0xb   :  { %31 = vst [vmem:[#allocation5] sm:$0xf] %v29_v4 }
   0xc   :  { %42 = dma.vmem_to_hbm [thread:$0]  %s38_s12, 64, %s40_s15, [#allocation4]  }
   0xd   :  { %101 = dma.done.wait [#allocation4], 64  }
   0xe   :  { %102 = vsyncadd [#allocation4], 4294967232 }
   0xf   :  { %47 = vsyncpa [#allocation3], 1 }
  0x10   :  { %48 = vsyncpa [#allocation4], 1 }

</bundles_post_ra>
